<compile_context>
chip_gen: v7x
topology: tpu7x:2x2x1
jax: 0.10.0
libtpu: 0.0.40
codegen_flags: <defaults>
</compile_context>

<pallas_src>
import jax
import jax.numpy as jnp
from jax.experimental import pallas as pl
from jax.experimental.pallas import tpu as pltpu

_LANES = 128


def _bypolar2binary_kernel(x_ref, o_ref):
    # x / 2 + 0.5  (multiply by 0.5 is bit-identical to divide by 2 for floats)
    x = x_ref[...]
    o_ref[...] = x * jnp.asarray(0.5, x.dtype) + jnp.asarray(0.5, x.dtype)


def bypolar2binary(x: jax.Array, max_block_rows: int = 4096) -> jax.Array:
    """Elementwise x / 2 + 0.5, any shape / float dtype, via a tiled Pallas kernel."""
    orig_shape = x.shape
    dtype = x.dtype
    total = x.size

    # Rows of 128 lanes (ceil).
    m = pl.cdiv(total, _LANES)

    # Block rows: as large as useful, rounded up to a multiple of 32 sublanes
    # (covers f32 (8), bf16 (16) and int8/fp8 (32) native sublane tiling).
    block_rows = min(max_block_rows, m)
    block_rows = ((block_rows + 31) // 32) * 32

    # Pad the flattened array up to a whole number of blocks (cheap JAX glue,
    # sliced off afterwards).  Every grid step is then a full aligned tile.
    m_pad = ((m + block_rows - 1) // block_rows) * block_rows
    pad_elems = m_pad * _LANES - total

    x_flat = jnp.ravel(x)
    if pad_elems:
        x_flat = jnp.concatenate([x_flat, jnp.zeros((pad_elems,), dtype)])
    x2d = jnp.reshape(x_flat, (m_pad, _LANES))

    grid = (m_pad // block_rows,)

    # Double-buffered footprint: 2 input bufs + 2 output bufs of one block,
    # plus ~1 MiB slack.  Clamp into a sane range (fits v7x's 64 MiB VMEM).
    block_bytes = block_rows * _LANES * jnp.dtype(dtype).itemsize
    vmem_limit = min(max(4 * block_bytes + (1 << 20), 16 << 20), 48 << 20)

    out = pl.pallas_call(
        _bypolar2binary_kernel,
        out_shape=jax.ShapeDtypeStruct((m_pad, _LANES), dtype),
        grid=grid,
        in_specs=[pl.BlockSpec((block_rows, _LANES), lambda i: (i, 0))],
        out_specs=pl.BlockSpec((block_rows, _LANES), lambda i: (i, 0)),
        compiler_params=pltpu.CompilerParams(
            dimension_semantics=("parallel",),
            vmem_limit_bytes=vmem_limit,
        ),
    )(x2d)

    y_flat = jnp.reshape(out, (-1,))[:total]
    return jnp.reshape(y_flat, orig_shape)


if __name__ == "__main__":
    key = jax.random.PRNGKey(0)
    # Small NCHW input consistent with the VQGAN loss module usage.
    x = jax.random.normal(key, (2, 4, 16, 16), dtype=jnp.float32)

    y = bypolar2binary(x)
    y = jax.block_until_ready(y)

    y_ref = x / 2 + 0.5
    assert y.shape == x.shape, y.shape
    assert y.dtype == x.dtype, y.dtype
    assert bool(jnp.allclose(y, y_ref, rtol=0.0, atol=1e-6)), "mismatch vs reference"

    print("KERNEL_OK")
</pallas_src>

<mosaic_0001>
module attributes {stable_mosaic.version = 11 : i64} {
  func.func @_bypolar2binary_kernel(%arg0: i32, %arg1: memref<32x128xf32, #tpu.memory_space<vmem>>, %arg2: memref<32x128xf32, #tpu.memory_space<vmem>>) attributes {dimension_semantics = [#tpu.dimension_semantics<parallel>], iteration_bounds = array<i64: 1>, scalar_prefetch = 0 : i64, scratch_operands = 0 : i64, tpu.core_type = #tpu.core_type<tc>, window_params = [{transform_indices = @transform_0, window_bounds = array<i64: 32, 128>}, {transform_indices = @transform_1, window_bounds = array<i64: 32, 128>}]} {
    %c0 = arith.constant 0 : index
    %c0_0 = arith.constant 0 : index
    %0 = vector.load %arg1[%c0, %c0_0] : memref<32x128xf32, #tpu.memory_space<vmem>>, vector<32x128xf32>
    %cst = arith.constant 5.000000e-01 : f32
    %1 = vector.broadcast %cst : f32 to vector<32x128xf32>
    %2 = arith.mulf %0, %1 : vector<32x128xf32>
    %cst_1 = arith.constant 5.000000e-01 : f32
    %3 = vector.broadcast %cst_1 : f32 to vector<32x128xf32>
    %4 = arith.addf %2, %3 : vector<32x128xf32>
    %c0_2 = arith.constant 0 : index
    %c0_3 = arith.constant 0 : index
    %5 = vector.load %arg2[%c0_2, %c0_3] : memref<32x128xf32, #tpu.memory_space<vmem>>, vector<32x128xf32>
    tpu.vector_store %arg2[%c0_2, %c0_3], %4 {strides = array<i32>} : memref<32x128xf32, #tpu.memory_space<vmem>>, vector<32x128xf32>,
    return
  }
  func.func @transform_0(%arg0: i32) -> (i32, i32) {
    %c0_i32 = arith.constant 0 : i32
    %c0_i32_0 = arith.constant 0 : i32
    return %arg0, %c0_i32 : i32, i32
  }
  func.func @transform_1(%arg0: i32) -> (i32, i32) {
    %c0_i32 = arith.constant 0 : i32
    %c0_i32_0 = arith.constant 0 : i32
    return %arg0, %c0_i32 : i32, i32
  }
}

</mosaic_0001>

<bundles_post_ra>
// kernel: tpu_custom_call.1
= control target key start
LH: loop header
LB: loop body
LE: loop exit
PB: predicated region body
PF: predicated region fallthrough
CT: control target
= control target key end

     0   :  { %6 = vsyncpa [#allocation3], 0  ;;  %s152_s0 = inlined_call_operand.hbm [shape: f32[32,128], index: 0, kind: input, shape index: {}]   ;;  %s153_s1 = inlined_call_operand.hbm [shape: f32[32,128], index: 1, kind: output, shape index: {}]  }
   0x1   :  { %7 = vsyncpa [#allocation4], 0  ;;  %s108_s6 = smov [#allocation2]   ;;  %s60_s10 = scalar_lea.hbm %s152_s0, 512 }
   0x2   :  { %s13_s7 = sshll.u32 %s108_s6, 4  ;;  %p61_p0 = scmp.ne.s32.totalorder %s152_s0, %s60_s10  ;;  %s14_s7 = int_to_ptr.vmem [resolvable:$true] %s13_s7 }
   0x3   :  { %p64_p1 = scmp.lt.u32.totalorder %s60_s10, %s152_s0 }
   0x5   :  { %p66_p2 = pnand %p64_p1, %p61_p0 }
   0x7   :  { %69 = shalt.err (!%p66_p2)
}
   0x8   :  { %s70_s15 = scalar_lea.vmem %s14_s7, 512  ;;  %p75_p4 = scmp.lt.s32.totalorder %s14_s7, %s14_s7 }
   0x9   :  { %p71_p3 = scmp.ne.s32.totalorder %s14_s7, %s70_s15  ;;  %p76_p5 = scmp.lt.s32.totalorder %s70_s15, %s70_s15 }
   0xb   :  { %p77_p6 = por %p76_p5, %p75_p4 }
   0xd   :  { %p78_p7 = pnand %p77_p6, %p71_p3 }
   0xf   :  { %81 = shalt.err (!%p78_p7)
}
  0x10   :  { %s109_s16 = smov 128   ;;  %s110_s17 = smov 8  }
  0x11   :  { %19 = dma.hbm_to_vmem [thread:$0]  %s152_s0, 512, %s14_s7, [#allocation3], %s109_s16, %s109_s16, %s110_s17  }
  0x12   :  { %104 = dma.done.wait [#allocation3], 512  }
  0x13   :  { %105 = vsyncadd [#allocation3], 4294966784  ;;  %v23_v0 = vld [vmem:[#allocation2] sm:$0xff]  ;;  %v24_v1 = vld [vmem:[#allocation2 + $0x8] sm:$0xff]  ;;  %s111_s20 = smov [#allocation5]  }
  0x14   :  { %v25_v2 = vld [vmem:[#allocation2 + $0x10] sm:$0xff]  ;;  %v27_v3 = vmul.f32 0.5, %v23_v0  ;;  %v28_v4 = vmul.f32 0.5, %v24_v1  ;;  %v26_v6 = vld [vmem:[#allocation2 + $0x18] sm:$0xff]  ;;  %s44_s21 = sshll.u32 %s111_s20, 4  ;;  %s45_s21 = int_to_ptr.vmem [resolvable:$true] %s44_s21 }
  0x15   :  { %v29_v5 = vmul.f32 0.5, %v25_v2  ;;  %v30_v7 = vmul.f32 0.5, %v26_v6  ;;  %s82_s0 = scalar_lea.vmem %s45_s21, 512  ;;  %p87_p9 = scmp.lt.s32.totalorder %s45_s21, %s45_s21 }
  0x16   :  { %v31_v8 = vadd.f32 0.5, %v27_v3  ;;  %v32_v9 = vadd.f32 0.5, %v28_v4  ;;  %p83_p8 = scmp.ne.s32.totalorder %s45_s21, %s82_s0  ;;  %p88_p10 = scmp.lt.s32.totalorder %s82_s0, %s82_s0 }
  0x17   :  { %v33_v10 = vadd.f32 0.5, %v29_v5  ;;  %v34_v11 = vadd.f32 0.5, %v30_v7 }
  0x18   :  { %35 = vst [vmem:[#allocation5] sm:$0xff] %v31_v8  ;;  %36 = vst [vmem:[#allocation5 + $0x8] sm:$0xff] %v32_v9  ;;  %p89_p11 = por %p88_p10, %p87_p9 }
  0x19   :  { %37 = vst [vmem:[#allocation5 + $0x10] sm:$0xff] %v33_v10  ;;  %38 = vst [vmem:[#allocation5 + $0x18] sm:$0xff] %v34_v11 }
  0x1a   :  { %p90_p12 = pnand %p89_p11, %p83_p8 }
  0x1c   :  { %93 = shalt.err (!%p90_p12)
}
  0x1d   :  { %s94_s24 = scalar_lea.hbm %s153_s1, 512 }
  0x1e   :  { %p95_p13 = scmp.ne.s32.totalorder %s153_s1, %s94_s24  ;;  %p98_p0 = scmp.lt.u32.totalorder %s94_s24, %s153_s1 }
  0x20   :  { %p100_p1 = pnand %p98_p0, %p95_p13 }
  0x22   :  { %103 = shalt.err (!%p100_p1)
}
  0x23   :  { %50 = dma.vmem_to_hbm [thread:$0]  %s45_s21, 512, %s153_s1, [#allocation4], %s109_s16, %s109_s16, %s110_s17  }
  0x24   :  { %106 = dma.done.wait [#allocation4], 512  }
  0x25   :  { %107 = vsyncadd [#allocation4], 4294966784 }
  0x26   :  { %54 = vsyncpa [#allocation3], 1 }
  0x27   :  { %55 = vsyncpa [#allocation4], 1 }

</bundles_post_ra>
